<compile_context>
chip_gen: v7x
topology: tpu7x:2x2x1
jax: 0.10.0
libtpu: 0.0.40
codegen_flags: <defaults>
</compile_context>

<pallas_src>
import jax
import jax.numpy as jnp
from jax.experimental import pallas as pl
from jax.experimental.pallas import tpu as pltpu

ALPHA = -0.4
_LANE = 128
_SUBLANE = 8


# ---------------------------------------------------------------------------
# Kernels
# ---------------------------------------------------------------------------
def _tp_kernel_resident(x_ref, o_ref):
    """Full H*W resident in VMEM per block.

    Pass 1: mean (x upcast inside the reduction, no f32 copy of x kept live).
    Pass 2: centered copy c -> exact unbiased variance; since
            x - thr == c - alpha*std, c is reused for the fused relu-sum/count.
    """
    f32 = jnp.float32
    L = x_ref.shape[-1]
    inv_l = f32(1.0 / L)
    # L == 1: torch.std(unbiased=True) yields NaN; we return a finite value.
    inv_lm1 = f32(1.0 / max(L - 1, 1))

    # Lane-dense (TN, TC) stats; broadcast only at the subtraction sites.
    mean = jnp.sum(x_ref[...].astype(f32), axis=-1) * inv_l            # (TN, TC)

    c = x_ref[...].astype(f32) - mean[..., None]                       # (TN, TC, L) f32
    var = jnp.sum(c * c, axis=-1) * inv_lm1                            # (TN, TC)
    adj = f32(ALPHA) * jnp.sqrt(var)
    thr = mean + adj

    d = c - adj[..., None]                                             # == x - thr
    mask = d > 0.0                                                     # reused twice
    relsum = jnp.sum(jnp.where(mask, d, 0.0), axis=-1)
    cnt = jnp.sum(mask.astype(f32), axis=-1) + 1.0
    pooled = relsum * pl.reciprocal(cnt, approx=False) + thr
    o_ref[...] = jnp.clip(pooled, 0.0, 1.0).astype(o_ref.dtype)


def _make_ltiled_kernel(l_total, tl, needs_mask):
    """Two-phase kernel for L streamed in TL-sized chunks.

    Grid axes: (n_tiles, c_tiles, phase, l_chunks).
      phase 0: chunked parallel-Welford moments into (TN, TC) scratch.
      phase 1: threshold at li == 0, then fused relu-sum / count accumulation,
               final writeback at the last chunk.
    The input is read from HBM twice (unavoidable: the threshold depends on
    full-image statistics).
    """
    f32 = jnp.float32
    inv_lm1 = 1.0 / max(l_total - 1, 1)

    def kernel(x_ref, o_ref, mean_ref, m2_ref, thr_ref, acc_ref, cnt_ref):
        ph = pl.program_id(2)
        li = pl.program_id(3)
        nl = pl.num_programs(3)

        if needs_mask:
            lane = jax.lax.broadcasted_iota(jnp.int32, x_ref.shape, 2)
            valid = (li * tl + lane) < l_total
        else:
            valid = None

        # ---------------- phase 0: chunked Welford moments ----------------
        @pl.when(jnp.logical_and(ph == 0, li == 0))
        def _():
            mean_ref[...] = jnp.zeros_like(mean_ref)
            m2_ref[...] = jnp.zeros_like(m2_ref)

        @pl.when(ph == 0)
        def _():
            xf = x_ref[...].astype(f32)
            if needs_mask:
                xf = jnp.where(valid, xf, 0.0)
            n_b = jnp.minimum(l_total - li * tl, tl).astype(f32)       # scalar
            n_a = (li * tl).astype(f32)                                # scalar
            n = n_a + n_b
            m_b = jnp.sum(xf, axis=-1) / n_b                           # (TN, TC)
            cb = xf - m_b[..., None]
            if needs_mask:
                m2_b = jnp.sum(jnp.where(valid, cb * cb, 0.0), axis=-1)
            else:
                m2_b = jnp.sum(cb * cb, axis=-1)
            delta = m_b - mean_ref[...]
            mean_ref[...] = mean_ref[...] + delta * (n_b / n)
            m2_ref[...] = m2_ref[...] + m2_b + delta * delta * (n_a * n_b / n)

        # ------------- phase 1: threshold, relu-sum and count -------------
        @pl.when(jnp.logical_and(ph == 1, li == 0))
        def _():
            var = jnp.maximum(m2_ref[...] * f32(inv_lm1), 0.0)
            thr_ref[...] = mean_ref[...] + f32(ALPHA) * jnp.sqrt(var)
            acc_ref[...] = jnp.zeros_like(acc_ref)
            cnt_ref[...] = jnp.zeros_like(cnt_ref)

        @pl.when(ph == 1)
        def _():
            d = x_ref[...].astype(f32) - thr_ref[...][..., None]
            mask = d > 0.0
            if needs_mask:
                mask = jnp.logical_and(mask, valid)
            acc_ref[...] += jnp.sum(jnp.where(mask, d, 0.0), axis=-1)
            cnt_ref[...] += jnp.sum(mask.astype(f32), axis=-1)

        @pl.when(jnp.logical_and(ph == 1, li == nl - 1))
        def _():
            cnt = cnt_ref[...] + 1.0
            pooled = acc_ref[...] * pl.reciprocal(cnt, approx=False) + thr_ref[...]
            o_ref[...] = jnp.clip(pooled, 0.0, 1.0).astype(o_ref.dtype)

    return kernel


# ---------------------------------------------------------------------------
# VMEM accounting and tile selection
# ---------------------------------------------------------------------------
def _divisors(n):
    return [d for d in range(1, n + 1) if n % d == 0]


def _vmem_capacity_bytes():
    try:
        return int(pltpu.get_tpu_info().vmem_capacity_bytes)
    except Exception:
        return 64 << 20            # conservative fallback (v7x per-core VMEM)


def _est_vmem_resident(tn, tc, l, itemsize):
    in_blk = tn * tc * l * itemsize
    out_blk = tn * tc * 4
    f32_temps = 2 * tn * tc * l * 4     # centered copy + one transient f32 temp
    return 2 * in_blk + 2 * out_blk + f32_temps + (1 << 20)


def _est_vmem_ltiled(tn, tc, tl, itemsize):
    in_blk = tn * tc * tl * itemsize
    out_blk = tn * tc * 4
    f32_temps = 2 * tn * tc * tl * 4
    scratch = 5 * tn * tc * 4
    return 2 * in_blk + 2 * out_blk + f32_temps + scratch + (1 << 20)


def _tile_options(N, C):
    # Output block (TN, TC): TC must be a multiple of 128 or equal C;
    # TN must be a multiple of 8 or equal N.  Both must divide the extent.
    tc_opts = sorted({d for d in _divisors(C) if d == C or d % _LANE == 0},
                     reverse=True)
    tn_opts = sorted({d for d in _divisors(N) if d == N or d % _SUBLANE == 0},
                     reverse=True)
    return tn_opts, tc_opts


def _select_tiles(N, C, L, itemsize, vmem_target):
    """Return (mode, TN, TC, TL).  mode == 'resident' keeps the full L in one
    block; 'ltiled' streams L in TL-sized chunks via a two-phase grid."""
    tn_opts, tc_opts = _tile_options(N, C)

    total_in = N * C * L * itemsize
    soft_cap = max(total_in // 8, 512 << 10)   # keep >= ~8 grid steps when big

    best_soft = None
    best_hard = None
    for tc in tc_opts:
        for tn in tn_opts:
            if _est_vmem_resident(tn, tc, L, itemsize) > vmem_target:
                continue
            blk = tn * tc * L * itemsize
            if best_hard is None or blk > best_hard[0]:
                best_hard = (blk, tn, tc)
            if blk <= soft_cap and (best_soft is None or blk > best_soft[0]):
                best_soft = (blk, tn, tc)
    best = best_soft if best_soft is not None else best_hard
    if best is not None:
        return "resident", best[1], best[2], L

    # Nothing fits with the full L resident -> stream L.  Use the smallest
    # valid (TN, TC) so TL (the contiguous DMA run) can be as long as possible.
    tn = min(tn_opts)
    tc = min(tc_opts)
    fixed = 2 * tn * tc * 4 + 5 * tn * tc * 4 + (1 << 20)
    per_l = tn * tc * (2 * itemsize + 2 * 4)
    tl = (max(vmem_target - fixed, 0) // per_l) // _LANE * _LANE
    tl = max(tl, _LANE)
    tl = min(tl, L)
    return "ltiled", tn, tc, int(tl)


def _vmem_limit_bytes(est, cap):
    hi = max(cap - (8 << 20), 32 << 20)
    return int(min(max(est + (4 << 20), 32 << 20), hi))


# ---------------------------------------------------------------------------
# Wrapper
# ---------------------------------------------------------------------------
def tp_forward(x, *, vmem_target_bytes=None):
    """TP forward: (N, C, H, W) float32/bfloat16 -> (N, C) float32.

    vmem_target_bytes optionally overrides the per-grid-step VMEM working-set
    budget (used by the self-test to force the tiled paths on small inputs);
    by default it is derived from the device's VMEM capacity.
    """
    N, C, H, W = x.shape
    L = H * W
    # Glue reshape in plain JAX; NCHW is kept so blocks stay contiguous along
    # (C, L).  An NHWC variant would only pay off if that layout is free
    # upstream (a dedicated transpose would cost a full HBM round-trip).
    x_flat = x.reshape(N, C, L)
    itemsize = jnp.dtype(x.dtype).itemsize

    vmem_cap = _vmem_capacity_bytes()
    if vmem_target_bytes is None:
        # ~60% of physical VMEM for the whole double-buffered working set:
        # v5e/v6e (128 MiB) -> ~76 MiB, v7x (64 MiB) -> ~38 MiB.
        vmem_target = min((vmem_cap * 3) // 5, 80 << 20)
    else:
        vmem_target = int(vmem_target_bytes)

    mode, TN, TC, TL = _select_tiles(N, C, L, itemsize, vmem_target)

    if mode == "resident":
        est = _est_vmem_resident(TN, TC, L, itemsize)
        return pl.pallas_call(
            _tp_kernel_resident,
            out_shape=jax.ShapeDtypeStruct((N, C), jnp.float32),
            grid_spec=pltpu.PrefetchScalarGridSpec(
                num_scalar_prefetch=0,
                grid=(N // TN, C // TC),
                in_specs=[pl.BlockSpec((TN, TC, L), lambda ni, ci: (ni, ci, 0))],
                out_specs=pl.BlockSpec((TN, TC), lambda ni, ci: (ni, ci)),
            ),
            compiler_params=pltpu.CompilerParams(
                dimension_semantics=("parallel", "parallel"),
                vmem_limit_bytes=_vmem_limit_bytes(est, vmem_cap),
            ),
        )(x_flat)

    # L-tiled two-phase path.
    nl = -(-L // TL)
    est = _est_vmem_ltiled(TN, TC, TL, itemsize)
    kernel = _make_ltiled_kernel(L, TL, needs_mask=(L % TL != 0))
    return pl.pallas_call(
        kernel,
        out_shape=jax.ShapeDtypeStruct((N, C), jnp.float32),
        grid_spec=pltpu.PrefetchScalarGridSpec(
            num_scalar_prefetch=0,
            grid=(N // TN, C // TC, 2, nl),
            in_specs=[pl.BlockSpec((TN, TC, TL),
                                   lambda ni, ci, ph, li: (ni, ci, li))],
            out_specs=pl.BlockSpec((TN, TC), lambda ni, ci, ph, li: (ni, ci)),
            scratch_shapes=[pltpu.VMEM((TN, TC), jnp.float32)
                            for _ in range(5)],
        ),
        compiler_params=pltpu.CompilerParams(
            dimension_semantics=("parallel", "parallel",
                                 "arbitrary", "arbitrary"),
            vmem_limit_bytes=_vmem_limit_bytes(est, vmem_cap),
        ),
    )(x_flat)


def tp_reference(x):
    """Pure-JAX reference mirroring the PyTorch module."""
    N, C, H, W = x.shape
    o = x.astype(jnp.float32).reshape(N, C, H * W)
    mean = jnp.mean(o, axis=2, keepdims=True)
    std = jnp.std(o, axis=2, keepdims=True, ddof=1)
    thr = mean + ALPHA * std
    o = jnp.maximum(o - thr, 0.0)
    nz = jnp.sum((o > 0).astype(jnp.float32), axis=2) + 1.0
    o = jnp.sum(o, axis=2) / nz + thr[..., 0]
    return jnp.clip(o, 0.0, 1.0)


if __name__ == "__main__":
    key = jax.random.PRNGKey(0)
    k0, k1, k2 = jax.random.split(key, 3)

    # 1) Small example matching the module (resident path, grid = (1, 1)).
    x = jax.random.uniform(k0, (2, 4, 16, 16), dtype=jnp.float32)
    out = jax.block_until_ready(tp_forward(x))
    ref = tp_reference(x)
    assert out.shape == (2, 4), out.shape
    assert jnp.allclose(out, ref, atol=1e-4, rtol=1e-4), (out, ref)

    # 2) (8, 128)-aligned multi-block resident path (grid over C), forced by a
    #    small per-step budget so the tiling / alignment logic is exercised.
    x2 = jax.random.uniform(k1, (8, 256, 8, 8), dtype=jnp.float32)
    out2 = jax.block_until_ready(
        tp_forward(x2, vmem_target_bytes=int(2.5 * (1 << 20))))
    assert jnp.allclose(out2, tp_reference(x2), atol=1e-4, rtol=1e-4)

    # 3) Two-phase L-tiled path with a ragged (masked) last chunk, bf16 input.
    x3 = jax.random.uniform(k2, (2, 8, 20, 20), dtype=jnp.bfloat16)
    out3 = jax.block_until_ready(
        tp_forward(x3, vmem_target_bytes=512 << 10))
    assert jnp.allclose(out3, tp_reference(x3), atol=1e-4, rtol=1e-4)

    print("KERNEL_OK")
</pallas_src>

<mosaic_0001>
module attributes {stable_mosaic.version = 11 : i64} {
  func.func @_tp_kernel_resident(%arg0: i32, %arg1: i32, %arg2: memref<2x4x256xf32, #tpu.memory_space<vmem>>, %arg3: memref<2x4xf32, #tpu.memory_space<vmem>>) attributes {dimension_semantics = [#tpu.dimension_semantics<parallel>, #tpu.dimension_semantics<parallel>], iteration_bounds = array<i64: 1, 1>, scalar_prefetch = 0 : i64, scratch_operands = 0 : i64, tpu.core_type = #tpu.core_type<tc>, window_params = [{transform_indices = @transform_0, window_bounds = array<i64: 2, 4, 256>}, {transform_indices = @transform_1, window_bounds = array<i64: 2, 4>}]} {
    %c0 = arith.constant 0 : index
    %c0_0 = arith.constant 0 : index
    %c0_1 = arith.constant 0 : index
    %0 = vector.load %arg2[%c0, %c0_0, %c0_1] : memref<2x4x256xf32, #tpu.memory_space<vmem>>, vector<2x4x256xf32>
    %cst = arith.constant dense<0.000000e+00> : vector<2x4xf32>
    %1 = vector.multi_reduction <add>, %0, %cst [2] : vector<2x4x256xf32> to vector<2x4xf32>
    %cst_2 = arith.constant 3.906250e-03 : f32
    %2 = vector.broadcast %cst_2 : f32 to vector<2x4xf32>
    %3 = arith.mulf %1, %2 : vector<2x4xf32>
    %c0_3 = arith.constant 0 : index
    %c0_4 = arith.constant 0 : index
    %c0_5 = arith.constant 0 : index
    %4 = vector.load %arg2[%c0_3, %c0_4, %c0_5] : memref<2x4x256xf32, #tpu.memory_space<vmem>>, vector<2x4x256xf32>
    %5 = vector.shape_cast %3 : vector<2x4xf32> to vector<2x4x1xf32>
    %6 = vector.broadcast %5 : vector<2x4x1xf32> to vector<2x4x256xf32>
    %7 = arith.subf %4, %6 : vector<2x4x256xf32>
    %8 = arith.mulf %7, %7 : vector<2x4x256xf32>
    %cst_6 = arith.constant dense<0.000000e+00> : vector<2x4xf32>
    %9 = vector.multi_reduction <add>, %8, %cst_6 [2] : vector<2x4x256xf32> to vector<2x4xf32>
    %cst_7 = arith.constant 0.00392156886 : f32
    %10 = vector.broadcast %cst_7 : f32 to vector<2x4xf32>
    %11 = arith.mulf %9, %10 : vector<2x4xf32>
    %12 = math.sqrt %11 : vector<2x4xf32>
    %cst_8 = arith.constant -4.000000e-01 : f32
    %13 = vector.broadcast %cst_8 : f32 to vector<2x4xf32>
    %14 = arith.mulf %13, %12 : vector<2x4xf32>
    %15 = arith.addf %3, %14 : vector<2x4xf32>
    %16 = vector.shape_cast %14 : vector<2x4xf32> to vector<2x4x1xf32>
    %17 = vector.broadcast %16 : vector<2x4x1xf32> to vector<2x4x256xf32>
    %18 = arith.subf %7, %17 : vector<2x4x256xf32>
    %cst_9 = arith.constant 0.000000e+00 : f32
    %19 = vector.broadcast %cst_9 : f32 to vector<2x4x256xf32>
    %20 = arith.cmpf ogt, %18, %19 : vector<2x4x256xf32>
    %cst_10 = arith.constant 0.000000e+00 : f32
    %21 = vector.broadcast %cst_10 : f32 to vector<2x4x256xf32>
    %22 = arith.select %20, %18, %21 : vector<2x4x256xi1>, vector<2x4x256xf32>
    %cst_11 = arith.constant dense<0.000000e+00> : vector<2x4xf32>
    %23 = vector.multi_reduction <add>, %22, %cst_11 [2] : vector<2x4x256xf32> to vector<2x4xf32>
    %24 = arith.extui %20 : vector<2x4x256xi1> to vector<2x4x256xi32>
    %25 = arith.sitofp %24 : vector<2x4x256xi32> to vector<2x4x256xf32>
    %cst_12 = arith.constant dense<0.000000e+00> : vector<2x4xf32>
    %26 = vector.multi_reduction <add>, %25, %cst_12 [2] : vector<2x4x256xf32> to vector<2x4xf32>
    %cst_13 = arith.constant 1.000000e+00 : f32
    %27 = vector.broadcast %cst_13 : f32 to vector<2x4xf32>
    %28 = arith.addf %26, %27 : vector<2x4xf32>
    %29 = tpu.reciprocal %28 : vector<2x4xf32> -> vector<2x4xf32>
    %30 = arith.mulf %23, %29 : vector<2x4xf32>
    %31 = arith.addf %30, %15 : vector<2x4xf32>
    %cst_14 = arith.constant 0.000000e+00 : f32
    %cst_15 = arith.constant 1.000000e+00 : f32
    %32 = vector.broadcast %cst_14 : f32 to vector<2x4xf32>
    %33 = arith.maximumf %32, %31 : vector<2x4xf32>
    %34 = vector.broadcast %cst_15 : f32 to vector<2x4xf32>
    %35 = arith.minimumf %34, %33 : vector<2x4xf32>
    %c0_16 = arith.constant 0 : index
    %c0_17 = arith.constant 0 : index
    %36 = vector.load %arg3[%c0_16, %c0_17] : memref<2x4xf32, #tpu.memory_space<vmem>>, vector<2x4xf32>
    tpu.vector_store %arg3[%c0_16, %c0_17], %35 {strides = array<i32>} : memref<2x4xf32, #tpu.memory_space<vmem>>, vector<2x4xf32>,
    return
  }
  func.func @transform_0(%arg0: i32, %arg1: i32) -> (i32, i32, i32) {
    %c0_i32 = arith.constant 0 : i32
    %c0_i32_0 = arith.constant 0 : i32
    return %arg0, %arg1, %c0_i32 : i32, i32, i32
  }
  func.func @transform_1(%arg0: i32, %arg1: i32) -> (i32, i32) {
    %c0_i32 = arith.constant 0 : i32
    return %arg0, %arg1 : i32, i32
  }
}

</mosaic_0001>

<bundles_post_ra>
// kernel: tpu_custom_call.1
= control target key start
LH: loop header
LB: loop body
LE: loop exit
PB: predicated region body
PF: predicated region fallthrough
CT: control target
= control target key end

     0   :  { %6 = vsyncpa [#allocation3], 0  ;;  %s342_s0 = inlined_call_operand.hbm [shape: f32[2,4,256], index: 0, kind: input, shape index: {}]   ;;  %s343_s1 = inlined_call_operand.hbm [shape: f32[2,4], index: 1, kind: output, shape index: {}]  }
   0x1   :  { %7 = vsyncpa [#allocation4], 0  ;;  %s272_s6 = smov [#allocation2]   ;;  %s224_s10 = scalar_lea.hbm %s342_s0, 256 }
   0x2   :  { %s13_s7 = sshll.u32 %s272_s6, 4  ;;  %p225_p0 = scmp.ne.s32.totalorder %s342_s0, %s224_s10  ;;  %s14_s7 = int_to_ptr.vmem [resolvable:$true] %s13_s7 }
   0x3   :  { %p228_p1 = scmp.lt.u32.totalorder %s224_s10, %s342_s0 }
   0x5   :  { %p230_p2 = pnand %p228_p1, %p225_p0 }
   0x7   :  { %233 = shalt.err (!%p230_p2)
}
   0x8   :  { %s234_s15 = scalar_lea.vmem %s14_s7, 256  ;;  %p239_p4 = scmp.lt.s32.totalorder %s14_s7, %s14_s7 }
   0x9   :  { %p235_p3 = scmp.ne.s32.totalorder %s14_s7, %s234_s15  ;;  %p240_p5 = scmp.lt.s32.totalorder %s234_s15, %s234_s15 }
   0xb   :  { %p241_p6 = por %p240_p5, %p239_p4 }
   0xd   :  { %p242_p7 = pnand %p241_p6, %p235_p3 }
   0xf   :  { %245 = shalt.err (!%p242_p7)
}
  0x10   :  { %s273_s16 = smov 128   ;;  %s274_s17 = smov 8  }
  0x11   :  { %19 = dma.hbm_to_vmem [thread:$0]  %s342_s0, 256, %s14_s7, [#allocation3], %s273_s16, %s273_s16, %s274_s17  }
  0x12   :  { %268 = dma.done.wait [#allocation3], 256  }
  0x13   :  { %269 = vsyncadd [#allocation3], 4294967040  ;;  %vm31_vm0 = vcmask 1043456   ;;  %v23_v0 = vld [vmem:[#allocation2] sm:$0xff]  ;;  %v24_v1 = vld [vmem:[#allocation2 + $0x8] sm:$0xff]  ;;  %v49_v12 = vlaneseq  ;;  %v276_v53 = vmov 0.0  }
  0x14   :  { %v27_v2 = vcombine.high %v23_v0, %v23_v0  ;;  %v32_v3 = vsel %vm31_vm0, %v23_v0, 0.0  ;;  %v28_v4 = vcombine.high %v24_v1, %v24_v1  ;;  %v37_v6 = vsel %vm31_vm0, %v24_v1, 0.0  ;;  %s277_s0 = smov [#allocation5]  }
  0x15   :  { %v275_v10 = vmov 839922192   ;;  %v305_v14 = vshrl.u32 %v49_v12, 7  ;;  %s197_s20 = sshll.u32 %s277_s0, 4  ;;  %vm186_vm7 = vcmask 1041409   ;;  %vm189_vm8 = vcmask 25600   ;;  %s198_s20 = int_to_ptr.vmem [resolvable:$true] %s197_s20 }
  0x16   :  { %v33_v5 = vsel %vm31_vm0, %v27_v2, 0.0  ;;  %v38_v7 = vsel %vm31_vm0, %v28_v4, 0.0  ;;  %v47_v11 = vunpack.c.l.s4 %v275_v10  ;;  %s246_s21 = scalar_lea.vmem %s198_s20, 32  ;;  %p251_p9 = scmp.lt.s32.totalorder %s198_s20, %s198_s20 }
  0x17   :  { %v34_v8 = vadd.f32 %v33_v5, %v32_v3  ;;  %v39_v9 = vadd.f32 %v38_v7, %v37_v6  ;;  %p247_p8 = scmp.ne.s32.totalorder %s198_s20, %s246_s21  ;;  %p252_p10 = scmp.lt.s32.totalorder %s246_s21, %s246_s21 }
  0x18   :  { %v48_v13 = vunpack.c.0.s8 %v47_v11 }
  0x19   :  { %35 = vadd.xlane.f32.xlu0 %v34_v8  ;;  %p253_p11 = por %p252_p10, %p251_p9 }
  0x1a   :  { %v51_v15 = vsub.s32 %v48_v13, %v305_v14 }
  0x1b   :  { %p254_p12 = pnand %p253_p11, %p247_p8 }
  0x1d   :  { %40 = vadd.xlane.f32.xlu0 %v39_v9 }
  0xa6   :  { %v36_v16 = vpop.xlane.xlu0 %35 }
  0xa7   :  { %v308_v17 = vmul.f32 0.00390625, %v36_v16 }
  0xa9   :  { %v52_v18 = vrot.slane %v308_v17, %v51_v15 }
  0xaa   :  { %v41_v19 = vpop.xlane.xlu0 %40 }
  0xab   :  { %v62_v20 = vsub.f32 %v23_v0, %v52_v18  ;;  %v311_v21 = vmul.f32 0.00390625, %v41_v19 }
  0xad   :  { %v59_v22 = vrot.slane %v311_v21, %v51_v15  ;;  %v64_v23 = vmul.f32 %v62_v20, %v62_v20 }
  0xaf   :  { %v63_v24 = vsub.f32 %v24_v1, %v59_v22  ;;  %v68_v25 = vcombine.high %v64_v23, %v64_v23  ;;  %v72_v26 = vsel %vm31_vm0, %v64_v23, 0.0 }
  0xb1   :  { %v73_v27 = vsel %vm31_vm0, %v68_v25, 0.0  ;;  %v65_v28 = vmul.f32 %v63_v24, %v63_v24 }
  0xb2   :  { %v74_v29 = vadd.f32 %v73_v27, %v72_v26  ;;  %v177_v26 = vand.u32 127, %v49_v12 }
  0xb3   :  { %v69_v30 = vcombine.high %v65_v28, %v65_v28  ;;  %v77_v31 = vsel %vm31_vm0, %v65_v28, 0.0 }
  0xb4   :  { %75 = vadd.xlane.f32.xlu1 %v74_v29 }
  0xb5   :  { %v78_v32 = vsel %vm31_vm0, %v69_v30, 0.0 }
  0xb6   :  { %v79_v33 = vadd.f32 %v78_v32, %v77_v31  ;;  %v180_v31 = vsub.s32 %v177_v26, %v305_v14 }
  0xb8   :  { %80 = vadd.xlane.f32.xlu1 %v79_v33 }
 0x141   :  { %v76_v34 = vpop.xlane.xlu1 %75 }
 0x142   :  { %v82_v35 = vmul.f32 0.003921569, %v76_v34 }
 0x144   :  { %216 = vrsqrt.f32 %v82_v35  ;;  %vm86_vm1 = vcmp.eq.f32.partialorder %v82_v35, inf  ;;  %v89_v40 = vand.u32 2147483648, %v82_v35  ;;  %vm88_vm2 = vcmp.eq.f32.partialorder %v82_v35, 0.0 }
 0x145   :  { %v81_v36 = vpop.xlane.xlu1 %80 }
 0x146   :  { %v83_v37 = vmul.f32 0.003921569, %v81_v36 }
 0x148   :  { %218 = vrsqrt.f32 %v83_v37  ;;  %vm93_vm3 = vcmp.eq.f32.partialorder %v83_v37, inf  ;;  %v96_v46 = vand.u32 2147483648, %v83_v37  ;;  %vm95_vm4 = vcmp.eq.f32.partialorder %v83_v37, 0.0 }
 0x14e   :  { %v217_v38 = vpop.eup %216 }
 0x14f   :  { %v85_v39 = vmul.f32 %v217_v38, %v82_v35 }
 0x151   :  { %v87_v41 = vsel %vm86_vm1, %v82_v35, %v85_v39 }
 0x152   :  { %v219_v42 = vpop.eup %218  ;;  %v90_v43 = vsel %vm88_vm2, %v89_v40, %v87_v41 }
 0x153   :  { %v98_v44 = vmul.f32 -0.4, %v90_v43  ;;  %v92_v45 = vmul.f32 %v219_v42, %v83_v37 }
 0x155   :  { %v110_v47 = vrot.slane %v98_v44, %v51_v15  ;;  %v94_v48 = vsel %vm93_vm3, %v83_v37, %v92_v45 }
 0x156   :  { %v97_v49 = vsel %vm95_vm4, %v96_v46, %v94_v48 }
 0x157   :  { %v120_v50 = vsub.f32 %v62_v20, %v110_v47  ;;  %v99_v51 = vmul.f32 -0.4, %v97_v49  ;;  %v100_v20 = vadd.f32 %v98_v44, %v308_v17 }
 0x159   :  { %vm122_vm5 = vcmp.gt.f32.partialorder %v120_v50, 0.0  ;;  %v117_v52 = vrot.slane %v99_v51, %v51_v15  ;;  %v101_v28 = vadd.f32 %v99_v51, %v311_v21 }
 0x15a   :  { %v206_v54 = vsel %vm122_vm5, 1.0, %v276_v53  ;;  %v124_v55 = vsel %vm122_vm5, %v120_v50, 0.0 }
 0x15b   :  { %v148_v56 = vcombine.high %v206_v54, %v206_v54  ;;  %v128_v57 = vcombine.high %v124_v55, %v124_v55  ;;  %v121_v58 = vsub.f32 %v63_v24, %v117_v52  ;;  %v152_v59 = vsel %vm31_vm0, %v206_v54, 0.0 }
 0x15c   :  { %v132_v3 = vsel %vm31_vm0, %v124_v55, 0.0 }
 0x15d   :  { %v153_v60 = vsel %vm31_vm0, %v148_v56, 0.0  ;;  %vm123_vm6 = vcmp.gt.f32.partialorder %v121_v58, 0.0  ;;  %v133_v62 = vsel %vm31_vm0, %v128_v57, 0.0 }
 0x15e   :  { %v154_v61 = vadd.f32 %v153_v60, %v152_v59  ;;  %v207_v63 = vsel %vm123_vm6, 1.0, %v276_v53  ;;  %v125_v0 = vsel %vm123_vm6, %v121_v58, 0.0  ;;  %v134_v4 = vadd.f32 %v133_v62, %v132_v3 }
 0x15f   :  { %v149_v1 = vcombine.high %v207_v63, %v207_v63  ;;  %v129_v2 = vcombine.high %v125_v0, %v125_v0  ;;  %v157_v5 = vsel %vm31_vm0, %v207_v63, 0.0  ;;  %v137_v9 = vsel %vm31_vm0, %v125_v0, 0.0 }
 0x160   :  { %155 = vadd.xlane.f32.xlu0 %v154_v61 }
 0x161   :  { %v158_v6 = vsel %vm31_vm0, %v149_v1, 0.0  ;;  %v138_v8 = vsel %vm31_vm0, %v129_v2, 0.0 }
 0x162   :  { %v159_v7 = vadd.f32 %v158_v6, %v157_v5  ;;  %v139_v10 = vadd.f32 %v138_v8, %v137_v9 }
 0x164   :  { %135 = vadd.xlane.f32.xlu0 %v134_v4  ;;  %160 = vadd.xlane.f32.xlu1 %v159_v7 }
 0x168   :  { %140 = vadd.xlane.f32.xlu1 %v139_v10 }
 0x1ed   :  { %v156_v11 = vpop.xlane.xlu0 %155 }
 0x1ee   :  { %v162_v13 = vadd.f32 1.0, %v156_v11 }
 0x1f0   :  { %220 = vrcp.f32 %v162_v13 }
 0x1f1   :  { %v161_v15 = vpop.xlane.xlu1 %160  ;;  %v136_v19 = vpop.xlane.xlu0 %135 }
 0x1f2   :  { %v163_v16 = vadd.f32 1.0, %v161_v15 }
 0x1f4   :  { %222 = vrcp.f32 %v163_v16 }
 0x1f5   :  { %v141_v25 = vpop.xlane.xlu1 %140 }
 0x1fa   :  { %v221_v18 = vpop.eup %220 }
 0x1fb   :  { %v166_v22 = vmul.f32 %v221_v18, %v136_v19 }
 0x1fd   :  { %v168_v23 = vadd.f32 %v166_v22, %v100_v20 }
 0x1fe   :  { %v223_v24 = vpop.eup %222 }
 0x1ff   :  { %v170_v27 = vmax.f32 %v168_v23, 0.0  ;;  %v167_v29 = vmul.f32 %v223_v24, %v141_v25 }
 0x201   :  { %v169_v30 = vadd.f32 %v167_v29, %v101_v28  ;;  %v172_v32 = vmin.f32 %v170_v27, 1.0 }
 0x203   :  { %v171_v33 = vmax.f32 %v169_v30, 0.0  ;;  %v181_v17 = vrot.slane %v172_v32, %v180_v31 }
 0x205   :  { %v173_v34 = vmin.f32 %v171_v33, 1.0 }
 0x207   :  { %v185_v35 = vrot.slane %v173_v34, %v180_v31 }
 0x209   :  { %v187_v36 = vsel %vm186_vm7, %v185_v35, %v181_v17 }
 0x20a   :  { %190 = vst.msk [vmem:[#allocation5] sm:$0x3] %vm189_vm8, %v187_v36 }
 0x20b   :  { %257 = shalt.err (!%p254_p12)
}
 0x20c   :  { %s258_s24 = scalar_lea.hbm %s343_s1, 32 }
 0x20d   :  { %p259_p13 = scmp.ne.s32.totalorder %s343_s1, %s258_s24  ;;  %p262_p0 = scmp.lt.u32.totalorder %s258_s24, %s343_s1 }
 0x20f   :  { %p264_p1 = pnand %p262_p0, %p259_p13 }
 0x211   :  { %267 = shalt.err (!%p264_p1)
}
 0x212   :  { %200 = dma.vmem_to_hbm [thread:$0]  %s198_s20, 32, %s343_s1, [#allocation4]  }
 0x213   :  { %270 = dma.done.wait [#allocation4], 32  }
 0x214   :  { %271 = vsyncadd [#allocation4], 4294967264 }
 0x215   :  { %204 = vsyncpa [#allocation3], 1 }
 0x216   :  { %205 = vsyncpa [#allocation4], 1 }

</bundles_post_ra>
